<compile_context>
chip_gen: v5e
topology: v5e:2x2
jax: 0.10.0
libtpu: 0.0.40
codegen_flags: <defaults>
</compile_context>

<pallas_src>
import jax
import jax.numpy as jnp
from jax.experimental import pallas as pl
from jax.experimental.pallas import tpu as pltpu


def _round_up(n, m):
    return ((n + m - 1) // m) * m


def conn_kernel(x_ref,
                w1_ref, b1_ref,
                w2_ref, b2_ref,
                w3_ref, b3_ref,
                w4_ref, b4_ref,
                o_ref):
    x = x_ref[...]  # (TILE_B, 3) f32

    # fc1 on the VPU: a K=3 contraction badly underfills the MXU, so do it as
    # three broadcast FMAs over a (TILE_B, 64) tile (all in f32).
    h = (x[:, 0:1] * w1_ref[0:1, :]
         + x[:, 1:2] * w1_ref[1:2, :]
         + x[:, 2:3] * w1_ref[2:3, :]
         + b1_ref[...])
    h = jnp.maximum(h, 0.0)

    # fc2 + relu  (bf16 MXU operands, f32 accumulation)
    h = jnp.dot(h.astype(jnp.bfloat16), w2_ref[...],
                preferred_element_type=jnp.float32)
    h = jnp.maximum(h + b2_ref[...], 0.0)

    # fc3 + relu
    h = jnp.dot(h.astype(jnp.bfloat16), w3_ref[...],
                preferred_element_type=jnp.float32)
    h = jnp.maximum(h + b3_ref[...], 0.0)

    # fc4 (no activation)
    h = jnp.dot(h.astype(jnp.bfloat16), w4_ref[...],
                preferred_element_type=jnp.float32)
    o_ref[...] = (h + b4_ref[...]).astype(o_ref.dtype)


def conn_forward(x, params, prediction_horizon, *, tile_b=1024):
    """x: (B, 3) float32 -> (B, prediction_horizon, 3) float32."""
    B = x.shape[0]
    out_dim = 3 * prediction_horizon
    (w1, b1), (w2, b2), (w3, b3), (w4, b4) = params

    # MXU layers get bf16 weights (accumulation stays f32 in-kernel); the
    # VPU-evaluated fc1 keeps f32 weights.
    w2b = w2.astype(jnp.bfloat16)
    w3b = w3.astype(jnp.bfloat16)
    w4b = w4.astype(jnp.bfloat16)

    # Batch tile: multiple of 8 (sublane), capped by the (rounded-up) batch.
    tile = max(8, min(int(tile_b), _round_up(B, 8)))
    tile = _round_up(tile, 8)
    b_pad = _round_up(B, tile)
    if b_pad != B:
        x = jnp.pad(x, ((0, b_pad - B), (0, 0)))

    grid = (b_pad // tile,)

    def const(a):
        return pl.BlockSpec(a.shape, lambda i: (0,) * a.ndim)

    flops = 2 * b_pad * (3 * 64 + 64 * 128 + 128 * 64 + 64 * out_dim)
    bytes_accessed = (b_pad * (3 + out_dim) * 4
                      + w1.size * 4 + b1.size * 4
                      + w2b.size * 2 + b2.size * 4
                      + w3b.size * 2 + b3.size * 4
                      + w4b.size * 2 + b4.size * 4)
    cost = pl.CostEstimate(flops=flops, transcendentals=0,
                           bytes_accessed=bytes_accessed)

    out = pl.pallas_call(
        conn_kernel,
        out_shape=jax.ShapeDtypeStruct((b_pad, out_dim), jnp.float32),
        grid=grid,
        in_specs=[
            pl.BlockSpec((tile, 3), lambda i: (i, 0)),
            const(w1), const(b1),
            const(w2b), const(b2),
            const(w3b), const(b3),
            const(w4b), const(b4),
        ],
        out_specs=pl.BlockSpec((tile, out_dim), lambda i: (i, 0)),
        compiler_params=pltpu.CompilerParams(
            dimension_semantics=("parallel",),
            vmem_limit_bytes=32 * 1024 * 1024,
        ),
        cost_estimate=cost,
    )(x, w1, b1, w2b, b2, w3b, b3, w4b, b4)

    out = out[:B]
    # Same semantics as torch's .view(-1, prediction_horizon, 3)
    return out.reshape(-1, prediction_horizon, 3)


def init_params(key, prediction_horizon):
    """Deterministic init mimicking nn.Linear's U(-1/sqrt(fan_in), 1/sqrt(fan_in)).

    Weights are stored as (in, out) -- transposed relative to PyTorch's
    (out, in) -- so the kernel does x @ W + b.  Biases are kept 2D (1, out)
    so they broadcast cleanly on TPU.
    """
    dims = [3, 64, 128, 64, 3 * prediction_horizon]
    params = []
    for i in range(4):
        fan_in, fan_out = dims[i], dims[i + 1]
        key, kw, kb = jax.random.split(key, 3)
        bound = 1.0 / jnp.sqrt(jnp.float32(fan_in))
        w = jax.random.uniform(kw, (fan_in, fan_out), jnp.float32, -bound, bound)
        b = jax.random.uniform(kb, (1, fan_out), jnp.float32, -bound, bound)
        params.append((w, b))
    return params


def conn_reference(x, params, prediction_horizon):
    """Pure-JAX f32 reference of the same forward pass."""
    (w1, b1), (w2, b2), (w3, b3), (w4, b4) = params
    h = jnp.maximum(x @ w1 + b1, 0.0)
    h = jnp.maximum(h @ w2 + b2, 0.0)
    h = jnp.maximum(h @ w3 + b3, 0.0)
    h = h @ w4 + b4
    return h.reshape(-1, prediction_horizon, 3)


if __name__ == "__main__":
    prediction_horizon = 4

    key = jax.random.PRNGKey(0)
    key, kx = jax.random.split(key)
    params = init_params(key, prediction_horizon)

    # Case 1: small batch (B=8) -> single grid step.
    x_small = jax.random.normal(kx, (8, 3), jnp.float32)
    y_small = jax.block_until_ready(
        conn_forward(x_small, params, prediction_horizon))
    y_ref_small = conn_reference(x_small, params, prediction_horizon)
    assert y_small.shape == (8, prediction_horizon, 3), y_small.shape
    assert jnp.allclose(y_small, y_ref_small, atol=3e-2, rtol=3e-2), \
        "small-batch mismatch vs reference"

    # Case 2: multi-step pipelined grid + batch padding (B=200, tile_b=64 ->
    # 4 grid steps, 56 padded rows sliced off).
    key, kx2 = jax.random.split(key)
    x_big = jax.random.normal(kx2, (200, 3), jnp.float32)
    y_big = jax.block_until_ready(
        conn_forward(x_big, params, prediction_horizon, tile_b=64))
    y_ref_big = conn_reference(x_big, params, prediction_horizon)
    assert y_big.shape == (200, prediction_horizon, 3), y_big.shape
    assert jnp.allclose(y_big, y_ref_big, atol=3e-2, rtol=3e-2), \
        "tiled-batch mismatch vs reference"

    print("KERNEL_OK")
</pallas_src>

<mosaic_0001>
module attributes {stable_mosaic.version = 11 : i64} {
  func.func @conn_kernel(%arg0: i32, %arg1: memref<8x3xf32, #tpu.memory_space<vmem>>, %arg2: memref<3x64xf32, #tpu.memory_space<vmem>>, %arg3: memref<1x64xf32, #tpu.memory_space<vmem>>, %arg4: memref<64x128xbf16, #tpu.memory_space<vmem>>, %arg5: memref<1x128xf32, #tpu.memory_space<vmem>>, %arg6: memref<128x64xbf16, #tpu.memory_space<vmem>>, %arg7: memref<1x64xf32, #tpu.memory_space<vmem>>, %arg8: memref<64x12xbf16, #tpu.memory_space<vmem>>, %arg9: memref<1x12xf32, #tpu.memory_space<vmem>>, %arg10: memref<8x12xf32, #tpu.memory_space<vmem>>) attributes {dimension_semantics = [#tpu.dimension_semantics<parallel>], iteration_bounds = array<i64: 1>, scalar_prefetch = 0 : i64, scratch_operands = 0 : i64, tpu.core_type = #tpu.core_type<tc>, window_params = [{transform_indices = @transform_0, window_bounds = array<i64: 8, 3>}, {pipeline_mode = #tpu.pipeline_mode<synchronous>, transform_indices = @transform_1, window_bounds = array<i64: 3, 64>}, {pipeline_mode = #tpu.pipeline_mode<synchronous>, transform_indices = @transform_2, window_bounds = array<i64: 1, 64>}, {pipeline_mode = #tpu.pipeline_mode<synchronous>, transform_indices = @transform_3, window_bounds = array<i64: 64, 128>}, {pipeline_mode = #tpu.pipeline_mode<synchronous>, transform_indices = @transform_4, window_bounds = array<i64: 1, 128>}, {pipeline_mode = #tpu.pipeline_mode<synchronous>, transform_indices = @transform_5, window_bounds = array<i64: 128, 64>}, {pipeline_mode = #tpu.pipeline_mode<synchronous>, transform_indices = @transform_6, window_bounds = array<i64: 1, 64>}, {pipeline_mode = #tpu.pipeline_mode<synchronous>, transform_indices = @transform_7, window_bounds = array<i64: 64, 12>}, {pipeline_mode = #tpu.pipeline_mode<synchronous>, transform_indices = @transform_8, window_bounds = array<i64: 1, 12>}, {transform_indices = @transform_9, window_bounds = array<i64: 8, 12>}]} {
    %c0 = arith.constant 0 : index
    %c0_0 = arith.constant 0 : index
    %0 = vector.load %arg1[%c0, %c0_0] : memref<8x3xf32, #tpu.memory_space<vmem>>, vector<8x3xf32>
    %1 = vector.extract_strided_slice %0 {offsets = [0, 0], sizes = [8, 1], strides = [1, 1]} : vector<8x3xf32> to vector<8x1xf32>
    %c0_1 = arith.constant 0 : index
    %c0_2 = arith.constant 0 : index
    %2 = vector.load %arg2[%c0_1, %c0_2] : memref<3x64xf32, #tpu.memory_space<vmem>>, vector<1x64xf32>
    %3 = vector.broadcast %1 : vector<8x1xf32> to vector<8x64xf32>
    %4 = vector.broadcast %2 : vector<1x64xf32> to vector<8x64xf32>
    %5 = arith.mulf %3, %4 : vector<8x64xf32>
    %6 = vector.extract_strided_slice %0 {offsets = [0, 1], sizes = [8, 1], strides = [1, 1]} : vector<8x3xf32> to vector<8x1xf32>
    %c1 = arith.constant 1 : index
    %c0_3 = arith.constant 0 : index
    %7 = vector.load %arg2[%c1, %c0_3] : memref<3x64xf32, #tpu.memory_space<vmem>>, vector<1x64xf32>
    %8 = vector.broadcast %6 : vector<8x1xf32> to vector<8x64xf32>
    %9 = vector.broadcast %7 : vector<1x64xf32> to vector<8x64xf32>
    %10 = arith.mulf %8, %9 : vector<8x64xf32>
    %11 = arith.addf %5, %10 : vector<8x64xf32>
    %12 = vector.extract_strided_slice %0 {offsets = [0, 2], sizes = [8, 1], strides = [1, 1]} : vector<8x3xf32> to vector<8x1xf32>
    %c2 = arith.constant 2 : index
    %c0_4 = arith.constant 0 : index
    %13 = vector.load %arg2[%c2, %c0_4] : memref<3x64xf32, #tpu.memory_space<vmem>>, vector<1x64xf32>
    %14 = vector.broadcast %12 : vector<8x1xf32> to vector<8x64xf32>
    %15 = vector.broadcast %13 : vector<1x64xf32> to vector<8x64xf32>
    %16 = arith.mulf %14, %15 : vector<8x64xf32>
    %17 = arith.addf %11, %16 : vector<8x64xf32>
    %c0_5 = arith.constant 0 : index
    %c0_6 = arith.constant 0 : index
    %18 = vector.load %arg3[%c0_5, %c0_6] : memref<1x64xf32, #tpu.memory_space<vmem>>, vector<1x64xf32>
    %19 = vector.broadcast %18 : vector<1x64xf32> to vector<8x64xf32>
    %20 = arith.addf %17, %19 : vector<8x64xf32>
    %cst = arith.constant 0.000000e+00 : f32
    %21 = vector.broadcast %cst : f32 to vector<8x64xf32>
    %22 = arith.maximumf %20, %21 : vector<8x64xf32>
    %23 = arith.truncf %22 : vector<8x64xf32> to vector<8x64xbf16>
    %c0_7 = arith.constant 0 : index
    %c0_8 = arith.constant 0 : index
    %24 = vector.load %arg4[%c0_7, %c0_8] : memref<64x128xbf16, #tpu.memory_space<vmem>>, vector<64x128xbf16>
    %cst_9 = arith.constant dense<0.000000e+00> : vector<8x128xf32>
    %25 = tpu.matmul %23, %24, %cst_9 {dimension_numbers = #tpu.dot_dimension_numbers<[1], [0], [0], [1], [0, 0, 1, 1], [], []>} : vector<8x64xbf16>, vector<64x128xbf16>, vector<8x128xf32> -> vector<8x128xf32>
    %c0_10 = arith.constant 0 : index
    %c0_11 = arith.constant 0 : index
    %26 = vector.load %arg5[%c0_10, %c0_11] : memref<1x128xf32, #tpu.memory_space<vmem>>, vector<1x128xf32>
    %27 = vector.broadcast %26 : vector<1x128xf32> to vector<8x128xf32>
    %28 = arith.addf %25, %27 : vector<8x128xf32>
    %cst_12 = arith.constant 0.000000e+00 : f32
    %29 = vector.broadcast %cst_12 : f32 to vector<8x128xf32>
    %30 = arith.maximumf %28, %29 : vector<8x128xf32>
    %31 = arith.truncf %30 : vector<8x128xf32> to vector<8x128xbf16>
    %c0_13 = arith.constant 0 : index
    %c0_14 = arith.constant 0 : index
    %32 = vector.load %arg6[%c0_13, %c0_14] : memref<128x64xbf16, #tpu.memory_space<vmem>>, vector<128x64xbf16>
    %cst_15 = arith.constant dense<0.000000e+00> : vector<8x64xf32>
    %33 = tpu.matmul %31, %32, %cst_15 {dimension_numbers = #tpu.dot_dimension_numbers<[1], [0], [0], [1], [0, 0, 1, 1], [], []>} : vector<8x128xbf16>, vector<128x64xbf16>, vector<8x64xf32> -> vector<8x64xf32>
    %c0_16 = arith.constant 0 : index
    %c0_17 = arith.constant 0 : index
    %34 = vector.load %arg7[%c0_16, %c0_17] : memref<1x64xf32, #tpu.memory_space<vmem>>, vector<1x64xf32>
    %35 = vector.broadcast %34 : vector<1x64xf32> to vector<8x64xf32>
    %36 = arith.addf %33, %35 : vector<8x64xf32>
    %cst_18 = arith.constant 0.000000e+00 : f32
    %37 = vector.broadcast %cst_18 : f32 to vector<8x64xf32>
    %38 = arith.maximumf %36, %37 : vector<8x64xf32>
    %39 = arith.truncf %38 : vector<8x64xf32> to vector<8x64xbf16>
    %c0_19 = arith.constant 0 : index
    %c0_20 = arith.constant 0 : index
    %40 = vector.load %arg8[%c0_19, %c0_20] : memref<64x12xbf16, #tpu.memory_space<vmem>>, vector<64x12xbf16>
    %cst_21 = arith.constant dense<0.000000e+00> : vector<8x12xf32>
    %41 = tpu.matmul %39, %40, %cst_21 {dimension_numbers = #tpu.dot_dimension_numbers<[1], [0], [0], [1], [0, 0, 1, 1], [], []>} : vector<8x64xbf16>, vector<64x12xbf16>, vector<8x12xf32> -> vector<8x12xf32>
    %c0_22 = arith.constant 0 : index
    %c0_23 = arith.constant 0 : index
    %42 = vector.load %arg9[%c0_22, %c0_23] : memref<1x12xf32, #tpu.memory_space<vmem>>, vector<1x12xf32>
    %43 = vector.broadcast %42 : vector<1x12xf32> to vector<8x12xf32>
    %44 = arith.addf %41, %43 : vector<8x12xf32>
    %c0_24 = arith.constant 0 : index
    %c0_25 = arith.constant 0 : index
    %45 = vector.load %arg10[%c0_24, %c0_25] : memref<8x12xf32, #tpu.memory_space<vmem>>, vector<8x12xf32>
    tpu.vector_store %arg10[%c0_24, %c0_25], %44 {strides = array<i32>} : memref<8x12xf32, #tpu.memory_space<vmem>>, vector<8x12xf32>,
    return
  }
  func.func @transform_0(%arg0: i32) -> (i32, i32) {
    %c0_i32 = arith.constant 0 : i32
    %c0_i32_0 = arith.constant 0 : i32
    return %arg0, %c0_i32 : i32, i32
  }
  func.func @transform_1(%arg0: i32) -> (i32, i32) {
    %c0_i32 = arith.constant 0 : i32
    %c0_i32_0 = arith.constant 0 : i32
    %c0_i32_1 = arith.constant 0 : i32
    return %c0_i32, %c0_i32_0 : i32, i32
  }
  func.func @transform_2(%arg0: i32) -> (i32, i32) {
    %c0_i32 = arith.constant 0 : i32
    %c0_i32_0 = arith.constant 0 : i32
    %c0_i32_1 = arith.constant 0 : i32
    return %c0_i32, %c0_i32_0 : i32, i32
  }
  func.func @transform_3(%arg0: i32) -> (i32, i32) {
    %c0_i32 = arith.constant 0 : i32
    %c0_i32_0 = arith.constant 0 : i32
    %c0_i32_1 = arith.constant 0 : i32
    return %c0_i32, %c0_i32_0 : i32, i32
  }
  func.func @transform_4(%arg0: i32) -> (i32, i32) {
    %c0_i32 = arith.constant 0 : i32
    %c0_i32_0 = arith.constant 0 : i32
    %c0_i32_1 = arith.constant 0 : i32
    return %c0_i32, %c0_i32_0 : i32, i32
  }
  func.func @transform_5(%arg0: i32) -> (i32, i32) {
    %c0_i32 = arith.constant 0 : i32
    %c0_i32_0 = arith.constant 0 : i32
    %c0_i32_1 = arith.constant 0 : i32
    return %c0_i32, %c0_i32_0 : i32, i32
  }
  func.func @transform_6(%arg0: i32) -> (i32, i32) {
    %c0_i32 = arith.constant 0 : i32
    %c0_i32_0 = arith.constant 0 : i32
    %c0_i32_1 = arith.constant 0 : i32
    return %c0_i32, %c0_i32_0 : i32, i32
  }
  func.func @transform_7(%arg0: i32) -> (i32, i32) {
    %c0_i32 = arith.constant 0 : i32
    %c0_i32_0 = arith.constant 0 : i32
    %c0_i32_1 = arith.constant 0 : i32
    return %c0_i32, %c0_i32_0 : i32, i32
  }
  func.func @transform_8(%arg0: i32) -> (i32, i32) {
    %c0_i32 = arith.constant 0 : i32
    %c0_i32_0 = arith.constant 0 : i32
    %c0_i32_1 = arith.constant 0 : i32
    return %c0_i32, %c0_i32_0 : i32, i32
  }
  func.func @transform_9(%arg0: i32) -> (i32, i32) {
    %c0_i32 = arith.constant 0 : i32
    %c0_i32_0 = arith.constant 0 : i32
    return %arg0, %c0_i32 : i32, i32
  }
}

</mosaic_0001>

<bundles_post_ra>
// kernel: tpu_custom_call.1
= control target key start
LH: loop header
LB: loop body
LE: loop exit
PB: predicated region body
PF: predicated region fallthrough
CT: control target
= control target key end

     0   :  { %v397_v1 = vmov 0   ;;  %v398_v2 = vmov 2   ;;  %s528_s0 = inlined_call_operand.vmem [shape: f32[8,3], index: 0, kind: input, shape index: {}]   ;;  %s529_s1 = inlined_call_operand.vmem [shape: f32[3,64], index: 1, kind: input, shape index: {}]   ;;  %s530_s2 = inlined_call_operand.vmem [shape: f32[1,64], index: 2, kind: input, shape index: {}]   ;;  %s531_s3 = inlined_call_operand.vmem [shape: bf16[64,128], index: 3, kind: input, shape index: {}]   ;;  %s532_s4 = inlined_call_operand.vmem [shape: f32[1,128], index: 4, kind: input, shape index: {}]   ;;  %s533_s5 = inlined_call_operand.vmem [shape: bf16[128,64], index: 5, kind: input, shape index: {}]   ;;  %s534_s6 = inlined_call_operand.vmem [shape: f32[1,64], index: 6, kind: input, shape index: {}]   ;;  %s535_s7 = inlined_call_operand.vmem [shape: bf16[64,12], index: 7, kind: input, shape index: {}]   ;;  %s536_s8 = inlined_call_operand.vmem [shape: f32[1,12], index: 8, kind: input, shape index: {}]   ;;  %s537_s9 = inlined_call_operand.hbm [shape: f32[8,12], index: 9, kind: output, shape index: {}]  }
   0x1   :  { %v34_v0 = vld [vmem:[%s528_s0] sm:$0xff]  ;;  %360 = vset.pattern.permute.xlu0 %v397_v1  ;;  %362 = vset.pattern.permute.xlu1 %v398_v2 }
   0x2   :  { %38 = vperm.xlu0 %360, %v34_v0   ;;  %53 = vperm.xlu1 %362, %v34_v0  }
   0x3   :  { %14 = vsyncpa [#allocation3], 0  ;;  %v399_v3 = vmov 1   ;;  %v343_v4 = vld [vmem:[%s531_s3 + $0x18] sm:$0xff]  ;;  %v342_v5 = vld [vmem:[%s531_s3 + $0x10] sm:$0xff]  ;;  %vm102_vm0 = vcmask 523264  }
   0x4   :  { %110 = vmatpush.bf16.msra.mxu0 %v343_v4  ;;  %v341_v6 = vld [vmem:[%s531_s3 + $0x8] sm:$0xff]  ;;  %v340_v7 = vld [vmem:[%s531_s3] sm:$0xff]  ;;  %v351_v8 = vld [vmem:[%s533_s5 + $0x38] sm:$0xff]  ;;  %s400_s28 = smov [#allocation2]   ;;  %s265_s10 = sshll.u32 %s537_s9, 4  ;;  %vm256_vm1 = vcmask 97280   ;;  %s266_s10 = int_to_ptr.hbm [resolvable:$true] %s265_s10 }
   0x5   :  { %189 = vmatpush.bf16.msra.mxu1 %v351_v8  ;;  %v350_v9 = vld [vmem:[%s533_s5 + $0x30] sm:$0xff]  ;;  %v349_v10 = vld [vmem:[%s533_s5 + $0x28] sm:$0xff]  ;;  %v348_v12 = vld [vmem:[%s533_s5 + $0x20] sm:$0xff]  ;;  %s263_s29 = sshll.u32 %s400_s28, 4  ;;  %s264_s29 = int_to_ptr.vmem [resolvable:$true] %s263_s29 }
   0x6   :  { %v347_v13 = vld [vmem:[%s533_s5 + $0x18] sm:$0xff]  ;;  %v364_v14 = vld [vmem:[%s529_s1] ss:$0 sm:$0xff]  ;;  %v365_v15 = vld [vmem:[%s529_s1 + $0x1] ss:$0 sm:$0xff] }
   0x7   :  { %v366_v16 = vld [vmem:[%s529_s1 + $0x2] ss:$0 sm:$0xff]  ;;  %v346_v18 = vld [vmem:[%s533_s5 + $0x10] sm:$0xff]  ;;  %v367_v24 = vld [vmem:[%s530_s2] ss:$0 sm:$0xff] }
   0x8   :  { %111 = vmatpush.bf16.msra.mxu0 %v342_v5  ;;  %v345_v29 = vld [vmem:[%s533_s5 + $0x8] sm:$0xff]  ;;  %v344_v30 = vld [vmem:[%s533_s5] sm:$0xff]  ;;  %v355_v31 = vld [vmem:[%s535_s7 + $0x18] sm:$0xff] }
   0x9   :  { %190 = vmatpush.bf16.msra.mxu1 %v350_v9  ;;  %247 = vmatpush.bf16.msra.mxu2 %v355_v31  ;;  %v354_v32 = vld [vmem:[%s535_s7 + $0x10] sm:$0xff]  ;;  %v368_v33 = vld [vmem:[%s532_s4] ss:$0 sm:$0xff]  ;;  %v353_v39 = vld [vmem:[%s535_s7 + $0x8] sm:$0xff] }
   0xa   :  { %361 = vset.pattern.permute.xlu0 %v399_v3  ;;  %v352_v40 = vld [vmem:[%s535_s7] sm:$0xff] }
   0xb   :  { %45 = vperm.xlu0 %361, %v34_v0   ;;  %v369_v41 = vld [vmem:[%s534_s6] ss:$0 sm:$0xff] }
   0xc   :  { %112 = vmatpush.bf16.msra.mxu0 %v341_v6  ;;  %v370_v47 = vld [vmem:[%s536_s8] ss:$0 sm:$0xff] }
   0xd   :  { %191 = vmatpush.bf16.msra.mxu1 %v349_v10  ;;  %248 = vmatpush.bf16.msra.mxu2 %v354_v32 }
  0x10   :  { %113 = vmatpush.bf16.msra.mxu0 %v340_v7 }
  0x11   :  { %192 = vmatpush.bf16.msra.mxu1 %v348_v12  ;;  %249 = vmatpush.bf16.msra.mxu2 %v353_v39 }
  0x13   :  { %363 = vset.pattern.permute.xlu0 %v398_v2 }
  0x15   :  { %193 = vmatpush.bf16.msra.mxu1 %v347_v13  ;;  %250 = vmatpush.bf16.msra.mxu2 %v352_v40 }
  0x19   :  { %194 = vmatpush.bf16.msra.mxu1 %v346_v18 }
  0x1d   :  { %195 = vmatpush.bf16.msra.mxu1 %v345_v29 }
  0x21   :  { %196 = vmatpush.bf16.msra.mxu1 %v344_v30 }
  0x74   :  { %v39_v11 = vpop.permute.xlu0 %38  ;;  %v54_v17 = vpop.permute.xlu1 %53 }
  0x75   :  { %v42_v20 = vmul.f32 %v364_v14, %v39_v11  ;;  %v57_v22 = vmul.f32 %v366_v16, %v54_v17 }
  0x7d   :  { %v46_v19 = vpop.permute.xlu0 %45 }
  0x7e   :  { %v49_v21 = vmul.f32 %v365_v15, %v46_v19 }
  0x80   :  { %v50_v23 = vadd.f32 %v49_v21, %v42_v20 }
  0x82   :  { %v58_v25 = vadd.f32 %v57_v22, %v50_v23 }
  0x84   :  { %v63_v26 = vadd.f32 %v367_v24, %v58_v25 }
  0x86   :  { %v64_v27 = vmax.f32 %v63_v26, 0.0 }
  0x88   :  { %v65_v28 = vpack.c.bf16 %v64_v27, %v64_v27 }
  0x8a   :  { %290 = vmatmul.msk.bf16.vlgmr.msra.gmra.mxu0 %vm102_vm0, %v65_v28 }
 0x107   :  { %v115_v34 = vpop.f32.mrf.mxu0 }
 0x108   :  { %v116_v35 = vadd.f32 %v368_v33, %v115_v34 }
 0x10a   :  { %v119_v36 = vmax.f32 %v116_v35, 0.0 }
 0x10c   :  { %v120_v37 = vpack.c.bf16 %v119_v36, %v119_v36 }
 0x10e   :  { %197 = vmatmul.bf16.vlgmr.msra.gmra.mxu1 %v120_v37 }
 0x10f   :  { %v117_v38 = vpop.f32.mrf.mxu0 }
 0x18b   :  { %v198_v42 = vpop.f32.mrf.mxu1 }
 0x18c   :  { %v199_v43 = vadd.f32 %v369_v41, %v198_v42 }
 0x18e   :  { %v202_v44 = vmax.f32 %v199_v43, 0.0 }
 0x190   :  { %v203_v45 = vpack.c.bf16 %v202_v44, %v202_v44 }
 0x192   :  { %339 = vmatmul.msk.bf16.vlgmr.msra.gmra.mxu2 %vm102_vm0, %v203_v45 }
 0x193   :  { %v200_v46 = vpop.f32.mrf.mxu1 }
 0x215   :  { %v252_v48 = vpop.f32.mrf.mxu2 }
 0x216   :  { %v253_v49 = vadd.f32 %v370_v47, %v252_v48 }
 0x218   :  { %257 = vst.msk [vmem:[#allocation2] sm:$0xff] %vm256_vm1, %v253_v49 }
 0x219   :  { %268 = dma.vmem_to_hbm [thread:$0]  %s264_s29, 128, %s266_s10, [#allocation3]  }
 0x21d   :  { %v254_v50 = vpop.f32.mrf.mxu2 }
 0x21e   :  { %395 = dma.done.wait [#allocation3], 128  }
 0x21f   :  { %396 = vsyncadd [#allocation3], 4294967168 }
 0x220   :  { %273 = vsyncpa [#allocation3], 1 }

</bundles_post_ra>
